<compile_context>
chip_gen: v5e
topology: v5e:2x2
jax: 0.10.0
libtpu: 0.0.40
codegen_flags: <defaults>
</compile_context>

<pallas_src>
import jax
import jax.numpy as jnp
import numpy as np
from jax.experimental import pallas as pl


def _identity_kernel(x_ref, o_ref):
    # Output aliases the input buffer (input_output_aliases={0: 0}), so the
    # correct result is already sitting in o_ref's HBM buffer.  Intentionally
    # move nothing: any load/store or DMA here would only add HBM traffic.
    del x_ref, o_ref


def identity(x: jnp.ndarray) -> jnp.ndarray:
    """Pallas identity: returns x unchanged (same shape, dtype, values)."""
    return pl.pallas_call(
        _identity_kernel,
        out_shape=jax.ShapeDtypeStruct(x.shape, x.dtype),
        in_specs=[pl.BlockSpec(memory_space=pl.ANY)],   # leave input in HBM, no auto-DMA
        out_specs=pl.BlockSpec(memory_space=pl.ANY),    # leave output in HBM, no auto-DMA
        input_output_aliases={0: 0},                    # output buffer == input buffer
    )(x)


if __name__ == "__main__":
    key = jax.random.PRNGKey(0)

    # Small NCHW input consistent with the module's typical placeholder use.
    x = jax.random.normal(key, (2, 4, 16, 16), dtype=jnp.float32)
    x_host = np.asarray(jax.device_get(x))  # snapshot before the aliasing call

    y = identity(x)
    jax.block_until_ready(y)

    assert y.shape == x_host.shape
    assert y.dtype == jnp.float32
    assert np.array_equal(np.asarray(jax.device_get(y)), x_host)

    # No tiling constraints: ragged, non-(8,128)-aligned shapes and narrow
    # dtypes go through the exact same path (previous version's weak spot).
    x2 = jax.random.normal(jax.random.PRNGKey(1), (3, 5, 7), dtype=jnp.bfloat16)
    x2_host = np.asarray(jax.device_get(x2))
    y2 = identity(x2)
    jax.block_until_ready(y2)
    assert y2.shape == x2_host.shape
    assert y2.dtype == jnp.bfloat16
    assert np.array_equal(np.asarray(jax.device_get(y2)), x2_host)

    print("KERNEL_OK")
</pallas_src>

<mosaic_0001>
module attributes {stable_mosaic.version = 11 : i64} {
  func.func @_identity_kernel(%arg0: memref<2x4x16x16xf32, #tpu.memory_space<any>>, %arg1: memref<2x4x16x16xf32, #tpu.memory_space<any>>) attributes {dimension_semantics = [], scalar_prefetch = 0 : i64, scratch_operands = 0 : i64, tpu.core_type = #tpu.core_type<tc>} {
    return
  }
}

</mosaic_0001>

<bundles_post_ra>
// kernel: tpu_custom_call.1
= control target key start
LH: loop header
LB: loop body
LE: loop exit
PB: predicated region body
PF: predicated region fallthrough
CT: control target
= control target key end

     0   :  { %s16_s0 = inlined_call_operand.hbm [shape: f32[2,4,16,16], index: 0, kind: input, shape index: {}, may-alias: {0,1}]   ;;  %s17_s1 = inlined_call_operand.hbm [shape: f32[2,4,16,16], index: 1, kind: output, shape index: {}, may-alias: {0,1}]  }

</bundles_post_ra>
